<compile_context>
chip_gen: v6e
topology: v6e:2x2x1
jax: 0.10.0
libtpu: 0.0.40
codegen_flags: <defaults>
</compile_context>

<pallas_src>
import math

import jax
import jax.numpy as jnp
from jax.experimental import pallas as pl
from jax.experimental.pallas import tpu as pltpu


def _round_up(x, m):
    return (x + m - 1) // m * m


# ----------------------------- Pallas kernel ------------------------------- #
def embed_kernel(mz_ref, idx_ref, freqs_ref, wsin_ref, wcos_ref, tab_ref,
                 out_ref):
    cdt = wsin_ref.dtype  # compute dtype for MXU operands (f32 or bf16)

    # Sinusoidal features; angles in f32 (mz up to ~2000 * large freqs).
    mz = mz_ref[...]                                   # (tm, 1) f32
    ang = mz * freqs_ref[...]                          # (tm, K_pad) f32

    # Split linear: sin(ang) @ W_sin + cos(ang) @ W_cos  (no lane concat).
    lin = jnp.dot(jnp.sin(ang).astype(cdt), wsin_ref[...],
                  preferred_element_type=jnp.float32)
    lin = lin + jnp.dot(jnp.cos(ang).astype(cdt), wcos_ref[...],
                        preferred_element_type=jnp.float32)

    # Fused embedding gather: one multi-hot (tm, V_pad) @ (V_pad, H_pad).
    # Indices are pre-offset in the wrapper so the three vocab ranges are
    # disjoint; the linear bias is already folded into the flag rows.
    idx = idx_ref[...]                                 # (tm, 3) i32
    tm = idx.shape[0]
    v = tab_ref.shape[0]
    iota = jax.lax.broadcasted_iota(jnp.int32, (tm, v), 1)
    multihot = ((idx[:, 0:1] == iota).astype(cdt)
                + (idx[:, 1:2] == iota).astype(cdt)
                + (idx[:, 2:3] == iota).astype(cdt))
    emb = jnp.dot(multihot, tab_ref[...], preferred_element_type=jnp.float32)

    out_ref[...] = (lin + emb).astype(out_ref.dtype)


# ------------------------------- Wrapper ------------------------------------ #
def absolute_input_embedding(moverz, peak_class, pos, ms1_ms2_flag, params,
                             *, tm=256, compute_dtype=jnp.float32):
    """moverz: (B, N) f32; peak_class/pos/ms1_ms2_flag: (B, N) i32.
    Returns (B, N, H) f32."""
    B, N = moverz.shape
    H = params["w"].shape[0]
    half = H // 2
    M = B * N

    V_pc = params["peak_class_tab"].shape[0]
    V_pos = params["pos_tab"].shape[0]
    V_flag = params["flag_tab"].shape[0]
    V_total = V_pc + V_pos + V_flag

    # Padded (lane-dense / MXU-friendly) sizes.
    H_pad = _round_up(H, 128)
    K_pad = _round_up(half, 128)
    V_pad = _round_up(V_total, 128)

    # Don't over-pad tiny inputs; keep tm a multiple of 8.
    tm = min(tm, _round_up(M, 8))
    M_pad = _round_up(M, tm)

    # --- token-level inputs (row-flattened, padded) --- #
    mz = moverz.reshape(M, 1).astype(jnp.float32)
    mz = jnp.pad(mz, ((0, M_pad - M), (0, 0)))

    idx = jnp.stack(
        [peak_class.reshape(M).astype(jnp.int32),
         pos.reshape(M).astype(jnp.int32) + V_pc,
         ms1_ms2_flag.reshape(M).astype(jnp.int32) + V_pc + V_pos],
        axis=-1)                                        # (M, 3)
    idx = jnp.pad(idx, ((0, M_pad - M), (0, 0)))        # padded rows -> idx 0 (sliced off)

    # --- weights (padded, K/N lane-dense) --- #
    w = params["w"]                                     # (H, H), y = x @ w + b
    b = params["b"]                                     # (1, H)
    wsin = jnp.zeros((K_pad, H_pad), jnp.float32).at[:half, :H].set(w[:half])
    wcos = jnp.zeros((K_pad, H_pad), jnp.float32).at[:half, :H].set(w[half:])
    freqs = jnp.zeros((1, K_pad), jnp.float32).at[:, :half].set(params["freqs"])
    # Padded freq lanes are 0 -> sin=0 contributes 0; cos=1 hits zero W rows.

    # --- fused embedding table (bias folded into always-selected flag rows) --- #
    tab = jnp.zeros((V_pad, H_pad), jnp.float32)
    tab = tab.at[:V_pc, :H].set(params["peak_class_tab"])
    tab = tab.at[V_pc:V_pc + V_pos, :H].set(params["pos_tab"])
    tab = tab.at[V_pc + V_pos:V_total, :H].set(params["flag_tab"] + b)

    wsin = wsin.astype(compute_dtype)
    wcos = wcos.astype(compute_dtype)
    tab = tab.astype(compute_dtype)

    row1 = pl.BlockSpec((tm, 1), lambda i: (i, 0))
    row3 = pl.BlockSpec((tm, 3), lambda i: (i, 0))
    full = lambda arr: pl.BlockSpec(arr.shape, lambda i: (0, 0))

    out = pl.pallas_call(
        embed_kernel,
        out_shape=jax.ShapeDtypeStruct((M_pad, H_pad), jnp.float32),
        grid=(M_pad // tm,),
        in_specs=[
            row1,            # moverz
            row3,            # packed (pc, pos+off, flag+off) indices
            full(freqs),     # inverse div_term, zero-padded to K_pad lanes
            full(wsin),      # W[:H//2]  -> (K_pad, H_pad)
            full(wcos),      # W[H//2:]  -> (K_pad, H_pad)
            full(tab),       # fused embedding table (V_pad, H_pad)
        ],
        out_specs=pl.BlockSpec((tm, H_pad), lambda i: (i, 0)),
        compiler_params=pltpu.CompilerParams(
            dimension_semantics=("parallel",)),
    )(mz, idx, freqs, wsin, wcos, tab)

    return out[:M, :H].reshape(B, N, H)


# --------------------------- Parameter creation ----------------------------- #
def make_params(key, hidden, lambda_max, lambda_min,
                peak_class_vocab, pos_vocab):
    k_w, k_b, k_pc, k_pos, k_flag = jax.random.split(key, 5)
    half = hidden // 2
    # div_term_i = (lambda_max / 2pi) * (lambda_min/lambda_max)^(2i/hidden)
    i = jnp.arange(0, hidden, 2, dtype=jnp.float32)
    div_term = (lambda_max / (2.0 * math.pi)) * (lambda_min / lambda_max) ** (i / hidden)
    freqs = (1.0 / div_term).reshape(1, half).astype(jnp.float32)

    w = (0.02 * jax.random.normal(k_w, (hidden, hidden))).astype(jnp.float32)
    b = (0.02 * jax.random.normal(k_b, (1, hidden))).astype(jnp.float32)
    pc_tab = jax.random.normal(k_pc, (peak_class_vocab, hidden)).astype(jnp.float32)
    pos_tab = jax.random.normal(k_pos, (pos_vocab, hidden)).astype(jnp.float32)
    flag_tab = jax.random.normal(k_flag, (2, hidden)).astype(jnp.float32)
    return dict(freqs=freqs, w=w, b=b, peak_class_tab=pc_tab,
                pos_tab=pos_tab, flag_tab=flag_tab)


# ---------------------------- Pure-JAX reference ---------------------------- #
def reference(moverz, peak_class, pos, ms1_ms2_flag, params):
    ang = moverz[..., None] * params["freqs"][0]            # (B, N, H/2)
    feat = jnp.concatenate([jnp.sin(ang), jnp.cos(ang)], axis=-1)
    lin = feat @ params["w"] + params["b"][0]
    return (lin
            + params["peak_class_tab"][peak_class]
            + params["pos_tab"][pos]
            + params["flag_tab"][ms1_ms2_flag])


if __name__ == "__main__":
    # Small synthetic cfg:
    #   hidden_size=32, moverz_lambda_max=1e4, moverz_lambda_min=1e-3
    #   product_max_charge=2, precursor_max_charge=3 -> peak_class vocab = 48
    #   ms2_max_peak_count=16
    B, N, H = 2, 8, 32
    peak_class_vocab = 2 * 6 + 2 + 3 + 1 + 30   # 48
    pos_vocab = 16

    key = jax.random.PRNGKey(0)
    k_params, k_mz, k_pc, k_pos, k_flag = jax.random.split(key, 5)

    params = make_params(k_params, H, 1e4, 1e-3, peak_class_vocab, pos_vocab)

    moverz = jax.random.uniform(k_mz, (B, N), jnp.float32, 0.0, 2000.0)
    peak_class = jax.random.randint(k_pc, (B, N), 0, peak_class_vocab, jnp.int32)
    pos = jax.random.randint(k_pos, (B, N), 0, pos_vocab, jnp.int32)
    ms1_ms2_flag = jax.random.randint(k_flag, (B, N), 0, 2, jnp.int32)

    # For v6e/v7x production runs, pass compute_dtype=jnp.bfloat16 (f32 accumulate).
    out = absolute_input_embedding(moverz, peak_class, pos, ms1_ms2_flag, params)
    out = jax.block_until_ready(out)

    ref = reference(moverz, peak_class, pos, ms1_ms2_flag, params)
    assert out.shape == (B, N, H)
    assert jnp.allclose(out, ref, atol=1e-4, rtol=1e-4), "mismatch vs reference"

    print("KERNEL_OK")
</pallas_src>

<mosaic_0001>
module attributes {stable_mosaic.version = 11 : i64} {
  func.func @embed_kernel(%arg0: i32, %arg1: memref<16x1xf32, #tpu.memory_space<vmem>>, %arg2: memref<16x3xi32, #tpu.memory_space<vmem>>, %arg3: memref<1x128xf32, #tpu.memory_space<vmem>>, %arg4: memref<128x128xf32, #tpu.memory_space<vmem>>, %arg5: memref<128x128xf32, #tpu.memory_space<vmem>>, %arg6: memref<128x128xf32, #tpu.memory_space<vmem>>, %arg7: memref<16x128xf32, #tpu.memory_space<vmem>>) attributes {dimension_semantics = [#tpu.dimension_semantics<parallel>], iteration_bounds = array<i64: 1>, scalar_prefetch = 0 : i64, scratch_operands = 0 : i64, tpu.core_type = #tpu.core_type<tc>, window_params = [{transform_indices = @transform_0, window_bounds = array<i64: 16, 1>}, {transform_indices = @transform_1, window_bounds = array<i64: 16, 3>}, {pipeline_mode = #tpu.pipeline_mode<synchronous>, transform_indices = @transform_2, window_bounds = array<i64: 1, 128>}, {pipeline_mode = #tpu.pipeline_mode<synchronous>, transform_indices = @transform_3, window_bounds = array<i64: 128, 128>}, {pipeline_mode = #tpu.pipeline_mode<synchronous>, transform_indices = @transform_4, window_bounds = array<i64: 128, 128>}, {pipeline_mode = #tpu.pipeline_mode<synchronous>, transform_indices = @transform_5, window_bounds = array<i64: 128, 128>}, {transform_indices = @transform_6, window_bounds = array<i64: 16, 128>}]} {
    %c0 = arith.constant 0 : index
    %c0_0 = arith.constant 0 : index
    %0 = vector.load %arg1[%c0, %c0_0] : memref<16x1xf32, #tpu.memory_space<vmem>>, vector<16x1xf32>
    %c0_1 = arith.constant 0 : index
    %c0_2 = arith.constant 0 : index
    %1 = vector.load %arg3[%c0_1, %c0_2] : memref<1x128xf32, #tpu.memory_space<vmem>>, vector<1x128xf32>
    %2 = vector.broadcast %0 : vector<16x1xf32> to vector<16x128xf32>
    %3 = vector.broadcast %1 : vector<1x128xf32> to vector<16x128xf32>
    %4 = arith.mulf %2, %3 : vector<16x128xf32>
    %5 = math.sin %4 : vector<16x128xf32>
    %c0_3 = arith.constant 0 : index
    %c0_4 = arith.constant 0 : index
    %6 = vector.load %arg4[%c0_3, %c0_4] : memref<128x128xf32, #tpu.memory_space<vmem>>, vector<128x128xf32>
    %cst = arith.constant dense<0.000000e+00> : vector<16x128xf32>
    %7 = tpu.matmul %5, %6, %cst {dimension_numbers = #tpu.dot_dimension_numbers<[1], [0], [0], [1], [0, 0, 1, 1], [], []>} : vector<16x128xf32>, vector<128x128xf32>, vector<16x128xf32> -> vector<16x128xf32>
    %8 = math.cos %4 : vector<16x128xf32>
    %c0_5 = arith.constant 0 : index
    %c0_6 = arith.constant 0 : index
    %9 = vector.load %arg5[%c0_5, %c0_6] : memref<128x128xf32, #tpu.memory_space<vmem>>, vector<128x128xf32>
    %cst_7 = arith.constant dense<0.000000e+00> : vector<16x128xf32>
    %10 = tpu.matmul %8, %9, %cst_7 {dimension_numbers = #tpu.dot_dimension_numbers<[1], [0], [0], [1], [0, 0, 1, 1], [], []>} : vector<16x128xf32>, vector<128x128xf32>, vector<16x128xf32> -> vector<16x128xf32>
    %11 = arith.addf %7, %10 : vector<16x128xf32>
    %c0_8 = arith.constant 0 : index
    %c0_9 = arith.constant 0 : index
    %12 = vector.load %arg2[%c0_8, %c0_9] : memref<16x3xi32, #tpu.memory_space<vmem>>, vector<16x3xi32>
    %13 = tpu.iota {dimensions = array<i32: 1>} : vector<16x128xi32>
    %14 = vector.extract_strided_slice %12 {offsets = [0, 0], sizes = [16, 1], strides = [1, 1]} : vector<16x3xi32> to vector<16x1xi32>
    %15 = vector.broadcast %14 : vector<16x1xi32> to vector<16x128xi32>
    %16 = arith.cmpi eq, %15, %13 : vector<16x128xi32>
    %17 = arith.extui %16 : vector<16x128xi1> to vector<16x128xi32>
    %18 = arith.sitofp %17 : vector<16x128xi32> to vector<16x128xf32>
    %19 = vector.extract_strided_slice %12 {offsets = [0, 1], sizes = [16, 1], strides = [1, 1]} : vector<16x3xi32> to vector<16x1xi32>
    %20 = vector.broadcast %19 : vector<16x1xi32> to vector<16x128xi32>
    %21 = arith.cmpi eq, %20, %13 : vector<16x128xi32>
    %22 = arith.extui %21 : vector<16x128xi1> to vector<16x128xi32>
    %23 = arith.sitofp %22 : vector<16x128xi32> to vector<16x128xf32>
    %24 = arith.addf %18, %23 : vector<16x128xf32>
    %25 = vector.extract_strided_slice %12 {offsets = [0, 2], sizes = [16, 1], strides = [1, 1]} : vector<16x3xi32> to vector<16x1xi32>
    %26 = vector.broadcast %25 : vector<16x1xi32> to vector<16x128xi32>
    %27 = arith.cmpi eq, %26, %13 : vector<16x128xi32>
    %28 = arith.extui %27 : vector<16x128xi1> to vector<16x128xi32>
    %29 = arith.sitofp %28 : vector<16x128xi32> to vector<16x128xf32>
    %30 = arith.addf %24, %29 : vector<16x128xf32>
    %c0_10 = arith.constant 0 : index
    %c0_11 = arith.constant 0 : index
    %31 = vector.load %arg6[%c0_10, %c0_11] : memref<128x128xf32, #tpu.memory_space<vmem>>, vector<128x128xf32>
    %cst_12 = arith.constant dense<0.000000e+00> : vector<16x128xf32>
    %32 = tpu.matmul %30, %31, %cst_12 {dimension_numbers = #tpu.dot_dimension_numbers<[1], [0], [0], [1], [0, 0, 1, 1], [], []>} : vector<16x128xf32>, vector<128x128xf32>, vector<16x128xf32> -> vector<16x128xf32>
    %33 = arith.addf %11, %32 : vector<16x128xf32>
    %c0_13 = arith.constant 0 : index
    %c0_14 = arith.constant 0 : index
    %34 = vector.load %arg7[%c0_13, %c0_14] : memref<16x128xf32, #tpu.memory_space<vmem>>, vector<16x128xf32>
    tpu.vector_store %arg7[%c0_13, %c0_14], %33 {strides = array<i32>} : memref<16x128xf32, #tpu.memory_space<vmem>>, vector<16x128xf32>,
    return
  }
  func.func @transform_0(%arg0: i32) -> (i32, i32) {
    %c0_i32 = arith.constant 0 : i32
    %c0_i32_0 = arith.constant 0 : i32
    return %arg0, %c0_i32 : i32, i32
  }
  func.func @transform_1(%arg0: i32) -> (i32, i32) {
    %c0_i32 = arith.constant 0 : i32
    %c0_i32_0 = arith.constant 0 : i32
    return %arg0, %c0_i32 : i32, i32
  }
  func.func @transform_2(%arg0: i32) -> (i32, i32) {
    %c0_i32 = arith.constant 0 : i32
    %c0_i32_0 = arith.constant 0 : i32
    %c0_i32_1 = arith.constant 0 : i32
    return %c0_i32, %c0_i32_0 : i32, i32
  }
  func.func @transform_3(%arg0: i32) -> (i32, i32) {
    %c0_i32 = arith.constant 0 : i32
    %c0_i32_0 = arith.constant 0 : i32
    %c0_i32_1 = arith.constant 0 : i32
    return %c0_i32, %c0_i32_0 : i32, i32
  }
  func.func @transform_4(%arg0: i32) -> (i32, i32) {
    %c0_i32 = arith.constant 0 : i32
    %c0_i32_0 = arith.constant 0 : i32
    %c0_i32_1 = arith.constant 0 : i32
    return %c0_i32, %c0_i32_0 : i32, i32
  }
  func.func @transform_5(%arg0: i32) -> (i32, i32) {
    %c0_i32 = arith.constant 0 : i32
    %c0_i32_0 = arith.constant 0 : i32
    %c0_i32_1 = arith.constant 0 : i32
    return %c0_i32, %c0_i32_0 : i32, i32
  }
  func.func @transform_6(%arg0: i32) -> (i32, i32) {
    %c0_i32 = arith.constant 0 : i32
    %c0_i32_0 = arith.constant 0 : i32
    return %arg0, %c0_i32 : i32, i32
  }
}

</mosaic_0001>

<bundles_post_ra>
// kernel: tpu_custom_call.1
= control target key start
LH: loop header
LB: loop body
LE: loop exit
PB: predicated region body
PF: predicated region fallthrough
CT: control target
= control target key end

     0   :  { %11 = vsyncpa [#allocation3], 0  ;;  %s1370_s0 = inlined_call_operand.vmem [shape: f32[16,1], index: 0, kind: input, shape index: {}]   ;;  %s1371_s1 = inlined_call_operand.vmem [shape: s32[16,3], index: 1, kind: input, shape index: {}]   ;;  %s1372_s2 = inlined_call_operand.vmem [shape: f32[1,128], index: 2, kind: input, shape index: {}]   ;;  %s1373_s3 = inlined_call_operand.hbm [shape: f32[128,128], index: 3, kind: input, shape index: {}]   ;;  %s1374_s4 = inlined_call_operand.hbm [shape: f32[128,128], index: 4, kind: input, shape index: {}]   ;;  %s1375_s5 = inlined_call_operand.hbm [shape: f32[128,128], index: 5, kind: input, shape index: {}]   ;;  %s1376_s6 = inlined_call_operand.hbm [shape: f32[16,128], index: 6, kind: output, shape index: {}]  }
   0x1   :  { %12 = vsyncpa [#allocation6], 0 }
   0x2   :  { %13 = vsyncpa [#allocation4], 0  ;;  %s1144_s21 = smov [#allocation5]   ;;  %s1145_s23 = smov [#allocation2]  }
   0x3   :  { %s37_s22 = sshll.u32 %s1144_s21, 4  ;;  %s25_s24 = sshll.u32 %s1145_s23, 4  ;;  %s38_s22 = int_to_ptr.vmem [resolvable:$true] %s37_s22  ;;  %s26_s24 = int_to_ptr.vmem [resolvable:$true] %s25_s24 }
   0x4   :  { %s1066_s25 = scalar_lea.vmem %s38_s22, 2048  ;;  %p1071_p1 = scmp.lt.s32.totalorder %s38_s22, %s38_s22 }
   0x5   :  { %p1067_p0 = scmp.ne.s32.totalorder %s38_s22, %s1066_s25  ;;  %p1072_p2 = scmp.lt.s32.totalorder %s1066_s25, %s1066_s25 }
   0x7   :  { %p1073_p3 = por %p1072_p2, %p1071_p1 }
   0x9   :  { %p1074_p4 = pnand %p1073_p3, %p1067_p0 }
   0xb   :  { %1077 = shalt.err (!%p1074_p4)
}
   0xc   :  { %s1146_s26 = smov 128   ;;  %s1147_s27 = smov 8  }
   0xd   :  { %43 = dma.hbm_to_vmem [thread:$0]  %s1374_s4, 2048, %s38_s22, [#allocation6], %s1146_s26, %s1146_s26, %s1147_s27  }
   0xe   :  { %s1086_s30 = scalar_lea.vmem %s26_s24, 2048  ;;  %p1091_p6 = scmp.lt.s32.totalorder %s26_s24, %s26_s24 }
   0xf   :  { %p1087_p5 = scmp.ne.s32.totalorder %s26_s24, %s1086_s30  ;;  %p1092_p7 = scmp.lt.s32.totalorder %s1086_s30, %s1086_s30 }
  0x11   :  { %p1093_p8 = por %p1092_p7, %p1091_p6 }
  0x13   :  { %p1094_p9 = pnand %p1093_p8, %p1087_p5 }
  0x15   :  { %1097 = shalt.err (!%p1094_p9)
}
  0x16   :  { %31 = dma.hbm_to_vmem [thread:$0]  %s1373_s3, 2048, %s26_s24, [#allocation3], %s1146_s26, %s1146_s26, %s1147_s27  }
  0x17   :  { %s1148_s9 = smov [#allocation7]  }
  0x18   :  { %s49_s10 = sshll.u32 %s1148_s9, 4  ;;  %s50_s10 = int_to_ptr.vmem [resolvable:$true] %s49_s10 }
  0x19   :  { %s1106_s11 = scalar_lea.vmem %s50_s10, 2048  ;;  %p1111_p11 = scmp.lt.s32.totalorder %s50_s10, %s50_s10 }
  0x1a   :  { %p1107_p10 = scmp.ne.s32.totalorder %s50_s10, %s1106_s11  ;;  %p1112_p12 = scmp.lt.s32.totalorder %s1106_s11, %s1106_s11 }
  0x1c   :  { %p1113_p13 = por %p1112_p12, %p1111_p11 }
  0x1e   :  { %p1114_p0 = pnand %p1113_p13, %p1107_p10 }
  0x20   :  { %1117 = shalt.err (!%p1114_p0)
}
  0x21   :  { %55 = dma.hbm_to_vmem [thread:$0]  %s1375_s5, 2048, %s50_s10, [#allocation6], %s1146_s26, %s1146_s26, %s1147_s27  }
  0x22   :  { %1138 = dma.done.wait [#allocation3], 2048  }
  0x23   :  { %1139 = vsyncadd [#allocation3], 4294965248 }
  0x24   :  { %1140 = dma.done.wait [#allocation6], 4096  }
  0x25   :  { %1141 = vsyncadd [#allocation6], 4294963200  ;;  %v1149_v0 = vmov 0   ;;  %v682_v1 = vld [vmem:[%s1371_s1] sm:$0xff]  ;;  %v66_v3 = vld [vmem:[%s1370_s0 + $0x8] sm:$0xff]  ;;  %v1150_v4 = vmov 1  }
  0x26   :  { %1046 = vset.pattern.permute.xlu1 %v1149_v0  ;;  %1045 = vset.pattern.permute.xlu0 %v1149_v0  ;;  %v65_v2 = vld [vmem:[%s1370_s0] sm:$0xff]  ;;  %v683_v5 = vld [vmem:[%s1371_s1 + $0x8] sm:$0xff]  ;;  %v1151_v6 = vmov 2   ;;  %v531_v7 = vld [vmem:[#allocation5 + $0x78] sm:$0xff]  ;;  %v1152_v62 = vmov 2102212464  }
  0x27   :  { %687 = vperm.xlu1 %1046, %v682_v1   ;;  %70 = vperm.xlu0 %1045, %v65_v2   ;;  %v309_v8 = vld [vmem:[#allocation2 + $0x78] sm:$0xff]  ;;  %v530_v9 = vld [vmem:[#allocation5 + $0x70] sm:$0xff]  ;;  %v529_v11 = vld [vmem:[#allocation5 + $0x68] sm:$0xff] }
  0x28   :  { %916 = vmatprep.subr.mxu0 %v531_v7  ;;  %951 = vmatprep.subr.mxu1 %v309_v8  ;;  %v308_v10 = vld [vmem:[#allocation2 + $0x70] sm:$0xff]  ;;  %v307_v12 = vld [vmem:[#allocation2 + $0x68] sm:$0xff]  ;;  %v528_v13 = vld [vmem:[#allocation5 + $0x60] sm:$0xff] }
  0x29   :  { %917 = vmatpush3.msra.mxu0 %v531_v7  ;;  %952 = vmatpush3.msra.mxu1 %v309_v8  ;;  %v306_v14 = vld [vmem:[#allocation2 + $0x60] sm:$0xff]  ;;  %v527_v15 = vld [vmem:[#allocation5 + $0x58] sm:$0xff]  ;;  %v526_v17 = vld [vmem:[#allocation5 + $0x50] sm:$0xff] }
  0x2a   :  { %918 = vmatprep.subr.mxu0 %v530_v9  ;;  %953 = vmatprep.subr.mxu1 %v308_v10  ;;  %v305_v16 = vld [vmem:[#allocation2 + $0x58] sm:$0xff]  ;;  %v304_v18 = vld [vmem:[#allocation2 + $0x50] sm:$0xff]  ;;  %v525_v19 = vld [vmem:[#allocation5 + $0x48] sm:$0xff] }
  0x2b   :  { %1047 = vset.pattern.permute.xlu1 %v1150_v4  ;;  %75 = vperm.xlu0 %1045, %v66_v3   ;;  %v303_v20 = vld [vmem:[#allocation2 + $0x48] sm:$0xff]  ;;  %v524_v21 = vld [vmem:[#allocation5 + $0x40] sm:$0xff]  ;;  %v523_v23 = vld [vmem:[#allocation5 + $0x38] sm:$0xff]  ;;  %v1154_v4 = vmov 1326507024  }
  0x2c   :  { %699 = vperm.xlu1 %1047, %v682_v1   ;;  %919 = vmatpush3.msra.mxu0 %v530_v9  ;;  %v302_v22 = vld [vmem:[#allocation2 + $0x40] sm:$0xff]  ;;  %v301_v24 = vld [vmem:[#allocation2 + $0x38] sm:$0xff]  ;;  %v522_v25 = vld [vmem:[#allocation5 + $0x30] sm:$0xff]  ;;  %v1155_v9 = vmov 683565275  }
  0x2d   :  { %920 = vmatprep.subr.mxu0 %v529_v11  ;;  %954 = vmatpush3.msra.mxu1 %v308_v10  ;;  %v300_v26 = vld [vmem:[#allocation2 + $0x30] sm:$0xff]  ;;  %v521_v27 = vld [vmem:[#allocation5 + $0x28] sm:$0xff]  ;;  %v520_v29 = vld [vmem:[#allocation5 + $0x20] sm:$0xff] }
  0x2e   :  { %921 = vmatpush3.msra.mxu0 %v529_v11  ;;  %955 = vmatprep.subr.mxu1 %v307_v12  ;;  %v299_v28 = vld [vmem:[#allocation2 + $0x28] sm:$0xff]  ;;  %v298_v30 = vld [vmem:[#allocation2 + $0x20] sm:$0xff]  ;;  %v519_v31 = vld [vmem:[#allocation5 + $0x18] sm:$0xff] }
  0x2f   :  { %690 = vperm.xlu0 %1045, %v683_v5   ;;  %922 = vmatprep.subr.mxu0 %v528_v13  ;;  %v297_v32 = vld [vmem:[#allocation2 + $0x18] sm:$0xff]  ;;  %v518_v33 = vld [vmem:[#allocation5 + $0x10] sm:$0xff]  ;;  %v517_v35 = vld [vmem:[#allocation5 + $0x8] sm:$0xff] }
  0x30   :  { %702 = vperm.xlu1 %1047, %v683_v5   ;;  %956 = vmatpush3.msra.mxu1 %v307_v12  ;;  %v296_v34 = vld [vmem:[#allocation2 + $0x10] sm:$0xff]  ;;  %v295_v36 = vld [vmem:[#allocation2 + $0x8] sm:$0xff]  ;;  %v516_v37 = vld [vmem:[#allocation5] sm:$0xff] }
  0x31   :  { %923 = vmatpush3.msra.mxu0 %v528_v13  ;;  %957 = vmatprep.subr.mxu1 %v306_v14  ;;  %v294_v38 = vld [vmem:[#allocation2] sm:$0xff]  ;;  %v1225_v39 = vld [vmem:[#allocation7 + $0x78] sm:$0xff] }
  0x32   :  { %924 = vmatprep.subr.mxu0 %v527_v15  ;;  %958 = vmatpush3.msra.mxu1 %v306_v14  ;;  %v839_v40 = vld [vmem:[%s1372_s2] ss:$0 sm:$0xff]  ;;  %v1156_v14 = vmov 2475754826   ;;  %s1159_s2 = smov [#allocation8]  }
  0x33   :  { %1048 = vset.pattern.permute.xlu0 %v1151_v6  ;;  %925 = vmatpush3.msra.mxu0 %v527_v15  ;;  %s826_s19 = sshll.u32 %s1159_s2, 4  ;;  %s827_s19 = int_to_ptr.vmem [resolvable:$true] %s826_s19 }
  0x34   :  { %1049 = vset.pattern.permute.xlu1 %v1151_v6  ;;  %713 = vperm.xlu0 %1048, %v682_v1   ;;  %v1153_v1 = vmov 920167782   ;;  %s1118_s20 = scalar_lea.vmem %s827_s19, 256  ;;  %p1123_p2 = scmp.lt.s32.totalorder %s827_s19, %s827_s19 }
  0x35   :  { %716 = vperm.xlu1 %1049, %v683_v5   ;;  %959 = vmatprep.subr.mxu1 %v305_v16  ;;  %p1119_p1 = scmp.ne.s32.totalorder %s827_s19, %s1118_s20  ;;  %p1124_p3 = scmp.lt.s32.totalorder %s1118_s20, %s1118_s20 }
  0x36   :  { %926 = vmatprep.subr.mxu0 %v526_v17  ;;  %960 = vmatpush3.msra.mxu1 %v305_v16 }
  0x37   :  { %927 = vmatpush3.msra.mxu0 %v526_v17  ;;  %961 = vmatprep.subr.mxu1 %v304_v18  ;;  %p1125_p4 = por %p1124_p3, %p1123_p2 }
  0x38   :  { %928 = vmatprep.subr.mxu0 %v525_v19  ;;  %962 = vmatpush3.msra.mxu1 %v304_v18 }
  0x39   :  { %929 = vmatpush3.msra.mxu0 %v525_v19  ;;  %963 = vmatprep.subr.mxu1 %v303_v20  ;;  %v1157_v19 = vmov 2131351028   ;;  %p1126_p5 = pnand %p1125_p4, %p1119_p1 }
  0x3a   :  { %930 = vmatprep.subr.mxu0 %v524_v21  ;;  %964 = vmatpush3.msra.mxu1 %v303_v20 }
  0x3b   :  { %931 = vmatpush3.msra.mxu0 %v524_v21  ;;  %965 = vmatprep.subr.mxu1 %v302_v22 }
  0x3c   :  { %932 = vmatprep.subr.mxu0 %v523_v23  ;;  %966 = vmatpush3.msra.mxu1 %v302_v22 }
  0x3d   :  { %933 = vmatpush3.msra.mxu0 %v523_v23  ;;  %967 = vmatprep.subr.mxu1 %v301_v24 }
  0x3e   :  { %934 = vmatprep.subr.mxu0 %v522_v25  ;;  %968 = vmatpush3.msra.mxu1 %v301_v24 }
  0x3f   :  { %935 = vmatpush3.msra.mxu0 %v522_v25  ;;  %969 = vmatprep.subr.mxu1 %v300_v26 }
  0x40   :  { %936 = vmatprep.subr.mxu0 %v521_v27  ;;  %970 = vmatpush3.msra.mxu1 %v300_v26 }
  0x41   :  { %937 = vmatpush3.msra.mxu0 %v521_v27  ;;  %971 = vmatprep.subr.mxu1 %v299_v28 }
  0x42   :  { %938 = vmatprep.subr.mxu0 %v520_v29  ;;  %972 = vmatpush3.msra.mxu1 %v299_v28 }
  0x43   :  { %939 = vmatpush3.msra.mxu0 %v520_v29  ;;  %973 = vmatprep.subr.mxu1 %v298_v30 }
  0x44   :  { %940 = vmatprep.subr.mxu0 %v519_v31  ;;  %974 = vmatpush3.msra.mxu1 %v298_v30 }
  0x45   :  { %941 = vmatpush3.msra.mxu0 %v519_v31  ;;  %975 = vmatprep.subr.mxu1 %v297_v32 }
  0x46   :  { %942 = vmatprep.subr.mxu0 %v518_v33  ;;  %976 = vmatpush3.msra.mxu1 %v297_v32 }
  0x47   :  { %943 = vmatpush3.msra.mxu0 %v518_v33  ;;  %977 = vmatprep.subr.mxu1 %v296_v34 }
  0x48   :  { %944 = vmatprep.subr.mxu0 %v517_v35  ;;  %978 = vmatpush3.msra.mxu1 %v296_v34 }
  0x49   :  { %945 = vmatpush3.msra.mxu0 %v517_v35  ;;  %979 = vmatprep.subr.mxu1 %v295_v36 }
  0x4a   :  { %946 = vmatprep.subr.mxu0 %v516_v37  ;;  %980 = vmatpush3.msra.mxu1 %v295_v36 }
  0x4b   :  { %947 = vmatpush3.msra.mxu0 %v516_v37  ;;  %981 = vmatprep.subr.mxu1 %v294_v38 }
  0x4c   :  { %986 = vmatprep.subr.mxu0 %v1225_v39  ;;  %982 = vmatpush3.msra.mxu1 %v294_v38 }
  0xa2   :  { %v71_v41 = vpop.permute.xlu0 %70 }
  0xa3   :  { %v1231_v42 = vmul.f32 %v839_v40, %v71_v41 }
  0xa5   :  { %v89_v43 = vand.u32 2139095040, %v1231_v42  ;;  %v86_v50 = vand.u32 2147483647, %v1231_v42 }
  0xa6   :  { %v76_v44 = vpop.permute.xlu0 %75 }
  0xa7   :  { %v90_v45 = vshrl.u32 %v89_v43, 23  ;;  %v1234_v46 = vmul.f32 %v839_v40, %v76_v44  ;;  %v1243_v56 = vand.u32 8388607, %v86_v50 }
  0xa9   :  { %v840_v47 = vadd.s32 4294967169, %v90_v45  ;;  %v190_v48 = vand.u32 2147483647, %v1234_v46  ;;  %v193_v49 = vand.u32 2139095040, %v1234_v46  ;;  %v94_v0 = vor.u32 8388608, %v1243_v56 }
  0xaa   :  { %vm192_vm14 = vcmp.lt.s32.totalorder %v1234_v46, 0 }
  0xab   :  { %v96_v51 = vadd.s32 1, %v840_v47  ;;  %v194_v52 = vshrl.u32 %v193_v49, 23  ;;  %v197_v53 = vand.u32 8388607, %v190_v48  ;;  %vm1321_vm15 = vcmp.le.f32.partialorder %v190_v48, 0.7853982 }
  0xad   :  { %vm97_vm0 = vcmp.gt.s32.totalorder %v96_v51, 0  ;;  %v844_v54 = vadd.s32 4294967169, %v194_v52  ;;  %v198_v60 = vor.u32 8388608, %v197_v53 }
  0xae   :  { %v98_v55 = vsel %vm97_vm0, %v96_v51, 0  ;;  %vm88_vm0 = vcmp.lt.s32.totalorder %v1231_v42, 0 }
  0xaf   :  { %v1245_v57 = vand.u32 31, %v98_v55  ;;  %v200_v58 = vadd.s32 1, %v844_v54  ;;  %v1247_v59 = vshrl.u32 %v98_v55, 5  ;;  %v1258_v8 = vshll.u32 %v198_v60, 8 }
  0xb1   :  { %v1250_v61 = vsub.s32 32, %v1245_v57  ;;  %v112_v63 = vshll.u32 %v1152_v62, %v1245_v57  ;;  %vm201_vm1 = vcmp.gt.s32.totalorder %v200_v58, 0  ;;  %v115_v3 = vshll.u32 %v1153_v1, %v1245_v57 }
  0xb2   :  { %v202_v6 = vsel %vm201_vm1, %v200_v58, 0  ;;  %vm121_vm2 = vcmp.lt.s32.totalorder %v1247_v59, 4  ;;  %v103_v10 = vshll.u32 %v1155_v9, %v1245_v57  ;;  %v106_v15 = vshll.u32 %v1156_v14, %v1245_v57 }
  0xb3   :  { %v113_v2 = vshrl.u32 %v1153_v1, %v1250_v61  ;;  %v116_v5 = vshrl.u32 %v1154_v4, %v1250_v61  ;;  %v204_v7 = vand.u32 31, %v202_v6  ;;  %v203_v13 = vshrl.u32 %v202_v6, 5 }
  0xb4   :  { %v104_v18 = vshrl.u32 %v1156_v14, %v1250_v61  ;;  %v107_v20 = vshrl.u32 %v1157_v19, %v1250_v61  ;;  %v109_v58 = vshll.u32 %v1157_v19, %v1245_v57  ;;  %v110_v60 = vshrl.u32 %v1152_v62, %v1250_v61 }
  0xb5   :  { %v114_v11 = vor.u32 %v113_v2, %v112_v63  ;;  %v117_v12 = vor.u32 %v116_v5, %v115_v3  ;;  %v205_v16 = vsub.s32 32, %v204_v7  ;;  %v207_v17 = vshll.u32 %v1155_v9, %v204_v7 }
  0xb6   :  { %v210_v23 = vshll.u32 %v1156_v14, %v204_v7  ;;  %v213_v24 = vshll.u32 %v1157_v19, %v204_v7  ;;  %v216_v28 = vshll.u32 %v1152_v62, %v204_v7  ;;  %v219_v31 = vshll.u32 %v1153_v1, %v204_v7 }
  0xb7   :  { %v127_v21 = vsel %vm121_vm2, %v114_v11, 920167782  ;;  %v131_v22 = vsel %vm121_vm2, %v117_v12, 1326507024  ;;  %v208_v25 = vshrl.u32 %v1156_v14, %v205_v16  ;;  %v211_v26 = vshrl.u32 %v1157_v19, %v205_v16 }
  0xb8   :  { %v214_v27 = vshrl.u32 %v1152_v62, %v205_v16  ;;  %v206_v29 = vshrl.u32 %v1155_v9, %v205_v16  ;;  %v217_v30 = vshrl.u32 %v1153_v1, %v205_v16  ;;  %v220_v32 = vshrl.u32 %v1154_v4, %v205_v16 }
  0xb9   :  { %v209_v33 = vor.u32 %v208_v25, %v207_v17  ;;  %v212_v34 = vor.u32 %v211_v26, %v210_v23  ;;  %vm222_vm3 = vcmp.lt.s32.totalorder %v203_v13, 1  ;;  %vm223_vm4 = vcmp.lt.s32.totalorder %v203_v13, 2 }
  0xba   :  { %v215_v35 = vor.u32 %v214_v27, %v213_v24  ;;  %v218_v36 = vor.u32 %v217_v30, %v216_v28  ;;  %v221_v37 = vor.u32 %v220_v32, %v219_v31  ;;  %vm225_vm5 = vcmp.lt.s32.totalorder %v203_v13, 4 }
  0xbb   :  { %vm224_vm6 = vcmp.lt.s32.totalorder %v203_v13, 3  ;;  %v230_v40 = vsel %vm222_vm3, %v209_v33, %v212_v34  ;;  %v226_v43 = vsel %vm222_vm3, %v206_v29, %v209_v33  ;;  %v105_v47 = vor.u32 %v104_v18, %v103_v10 }
  0xbc   :  { %v227_v38 = vsel %vm225_vm5, %v215_v35, 2102212464  ;;  %v234_v41 = vsel %vm222_vm3, %v212_v34, %v215_v35  ;;  %v231_v44 = vsel %vm225_vm5, %v218_v36, 920167782  ;;  %v235_v45 = vsel %vm225_vm5, %v221_v37, 1326507024 }
  0xbd   :  { %v228_v49 = vsel %vm224_vm6, %v212_v34, %v227_v38  ;;  %v232_v51 = vsel %vm224_vm6, %v215_v35, %v231_v44  ;;  %v236_v52 = vsel %vm224_vm6, %v218_v36, %v235_v45  ;;  %v108_v53 = vor.u32 %v107_v20, %v106_v15 }
  0xbe   :  { %v233_v54 = vsel %vm223_vm4, %v230_v40, %v232_v51  ;;  %v237_v55 = vsel %vm223_vm4, %v234_v41, %v236_v52  ;;  %v111_v4 = vor.u32 %v110_v60, %v109_v58  ;;  %vm118_vm7 = vcmp.lt.s32.totalorder %v1247_v59, 1 }
  0xbf   :  { %v1273_v63 = vmul.u32.u64.low %v1258_v8, %v237_v55  ;;  %v1274_v1 = vmul.u32.u64.high %v1258_v8, %v237_v55, %v1273_v63  ;;  %v1277_v2 = vmul.u32.u64.low %v1258_v8, %v233_v54  ;;  %v1278_v3 = vmul.u32.u64.high %v1258_v8, %v233_v54, %v1277_v2 }
  0xc0   :  { %vm120_vm8 = vcmp.lt.s32.totalorder %v1247_v59, 3  ;;  %v229_v5 = vsel %vm223_vm4, %v226_v43, %v228_v49  ;;  %v126_v57 = vsel %vm118_vm7, %v105_v47, %v108_v53  ;;  %v102_v6 = vshrl.u32 %v1155_v9, %v1250_v61 }
  0xc1   :  { %v132_v62 = vsel %vm120_vm8, %v114_v11, %v131_v22  ;;  %v123_v7 = vsel %vm121_vm2, %v111_v4, 2102212464  ;;  %v128_v10 = vsel %vm120_vm8, %v111_v4, %v127_v21  ;;  %v130_v12 = vsel %vm118_vm7, %v108_v53, %v111_v4 }
  0xc2   :  { %vm247_vm9 = vc.u32 %v1274_v1, %v1277_v2  ;;  %v248_v13 = vadd.s32 1, %v1278_v3  ;;  %vm119_vm10 = vcmp.lt.s32.totalorder %v1247_v59, 2  ;;  %v134_v11 = vshll.u32 %v94_v0, 8 }
  0xc3   :  { %v245_v61 = vmul.u32 %v1258_v8, %v229_v5  ;;  %v122_v9 = vsel %vm118_vm7, %v102_v6, %v105_v47  ;;  %v129_v14 = vsel %vm119_vm10, %v126_v57, %v128_v10  ;;  %v133_v15 = vsel %vm119_vm10, %v130_v12, %v132_v62 }
  0xc4   :  { %v249_v16 = vsel %vm247_vm9, %v248_v13, %v1278_v3  ;;  %v124_v17 = vsel %vm120_vm8, %v108_v53, %v123_v7  ;;  %v1305_v18 = vmul.u32.u64.low %v134_v11, %v133_v15  ;;  %v1306_v19 = vmul.u32.u64.high %v134_v11, %v133_v15, %v1305_v18 }
  0xc5   :  { %v250_v20 = vadd.s32 %v249_v16, %v245_v61  ;;  %v1308_v21 = vmul.u32.u64.low %v134_v11, %v129_v14  ;;  %v1309_v22 = vmul.u32.u64.high %v134_v11, %v129_v14, %v1308_v21  ;;  %v125_v0 = vsel %vm119_vm10, %v122_v9, %v124_v17  ;;  %v688_v16 = vpop.permute.xlu1 %687 }
  0xc6   :  { %v141_v24 = vmul.u32 %v134_v11, %v125_v0  ;;  %v246_v40 = vadd.s32 %v1277_v2, %v1274_v1  ;;  %v684_v18 = vlaneseq  ;;  %vm87_vm1 = vcmp.le.f32.partialorder %v86_v50, 0.7853982 }
  0xc7   :  { %v251_v56 = vadd.s32 536870912, %v250_v20  ;;  %vm143_vm11 = vc.u32 %v1306_v19, %v1308_v21  ;;  %v144_v23 = vadd.s32 1, %v1309_v22  ;;  %v142_v58 = vadd.s32 %v1308_v21, %v1306_v19 }
  0xc8   :  { %v1338_v0 = vand.u32 127, %v684_v18  ;;  %vm178_vm9 = vweird.f32 %v1231_v42  ;;  %vm282_vm10 = vweird.f32 %v1234_v46 }
  0xc9   :  { %v252_v8 = vshrl.u32 %v251_v56, 30  ;;  %v145_v26 = vsel %vm143_vm11, %v144_v23, %v1309_v22  ;;  %v1334_v22 = vpop.permute.xlu0 %690 }
  0xca   :  { %v146_v59 = vadd.s32 %v145_v26, %v141_v24  ;;  %v700_v24 = vpop.permute.xlu1 %699  ;;  %vm692_vm2 = vcmp.eq.s32.totalorder %v688_v16, %v1338_v0  ;;  %v728_v16 = vld [vmem:[#allocation7 + $0x10] sm:$0xff] }
  0xcb   :  { %v253_v25 = vshll.u32 %v252_v8, 30  ;;  %v276_v14 = vsub.s32 4, %v252_v8  ;;  %vm704_vm3 = vcmp.eq.s32.totalorder %v700_v24, %v1338_v0 }
  0xcc   :  { %v147_v28 = vadd.s32 536870912, %v146_v59 }
  0xcd   :  { %v254_v27 = vsub.s32 %v250_v20, %v253_v25  ;;  %v277_v48 = vsel %vm192_vm14, %v276_v14, %v252_v8  ;;  %v714_v25 = vpop.permute.xlu0 %713 }
  0xce   :  { %v148_v30 = vshrl.u32 %v147_v28, 30  ;;  %v279_v56 = vsel %vm1321_vm15, 0, %v277_v48  ;;  %vm718_vm4 = vcmp.eq.s32.totalorder %v714_v25, %v1338_v0  ;;  %v703_v13 = vpop.permute.xlu1 %702 }
  0xcf   :  { %v256_v29 = vsub.s32 0, %v254_v27  ;;  %v283_v8 = vadd.s32 3, %v279_v56 }
  0xd0   :  { %v149_v32 = vshll.u32 %v148_v30, 30  ;;  %v172_v19 = vsub.s32 4, %v148_v30 }
  0xd1   :  { %v845_v31 = vmin.u32 %v256_v29, %v254_v27  ;;  %v506_v29 = vand.u32 3, %v279_v56 }
  0xd2   :  { %v150_v34 = vsub.s32 %v146_v59, %v149_v32  ;;  %v173_v23 = vsel %vm88_vm0, %v172_v19, %v148_v30  ;;  %v1158_v59 = vmov 0.0   ;;  %v717_v14 = vpop.permute.xlu1 %716  ;;  %v727_v19 = vld [vmem:[#allocation7 + $0x8] sm:$0xff] }
  0xd3   :  { %v258_v33 = vclz %v845_v31  ;;  %v175_v50 = vsel %vm87_vm1, 0, %v173_v23  ;;  %v858_v28 = vsel %vm704_vm3, 1.0, %v1158_v59  ;;  %vm508_vm5 = vcmp.eq.s32.totalorder %v506_v29, 0 }
  0xd4   :  { %v152_v36 = vsub.s32 0, %v150_v34  ;;  %v179_v32 = vadd.s32 3, %v175_v50  ;;  %vm511_vm6 = vcmp.eq.s32.totalorder %v506_v29, 2  ;;  %vm693_vm3 = vcmp.eq.s32.totalorder %v1334_v22, %v1338_v0 }
  0xd5   :  { %v846_v35 = vadd.s32 4294967294, %v258_v33  ;;  %v284_v33 = vand.u32 3, %v283_v8 }
  0xd6   :  { %v841_v38 = vmin.u32 %v152_v36, %v150_v34  ;;  %v403_v36 = vand.u32 3, %v175_v50 }
  0xd7   :  { %vm847_vm12 = vcmp.lt.s32.totalorder %v846_v35, 0  ;;  %vm286_vm7 = vcmp.eq.s32.totalorder %v284_v33, 0  ;;  %vm289_vm8 = vcmp.eq.s32.totalorder %v284_v33, 2 }
  0xd8   :  { %v261_v37 = vsel %vm847_vm12, 0, %v846_v35  ;;  %v154_v44 = vclz %v841_v38  ;;  %v180_v38 = vand.u32 3, %v179_v32  ;;  %vm408_vm11 = vcmp.eq.s32.totalorder %v403_v36, 2 }
  0xd9   :  { %v262_v41 = vsub.s32 32, %v261_v37  ;;  %v266_v43 = vsub.s32 4294967266, %v261_v37  ;;  %v263_v45 = vshll.u32 %v254_v27, %v261_v37  ;;  %v856_v27 = vsel %vm692_vm2, 1.0, %v1158_v59 }
  0xda   :  { %v842_v51 = vadd.s32 4294967294, %v154_v44  ;;  %v710_v35 = vadd.f32 %v858_v28, %v856_v27  ;;  %v860_v37 = vsel %vm718_vm4, 1.0, %v1158_v59  ;;  %vm507_vm12 = vcmp.lt.s32.totalorder %v506_v29, 2 }
  0xdb   :  { %v264_v47 = vshrl.u32 %v246_v40, %v262_v41  ;;  %v267_v49 = vadd.s32 127, %v266_v43  ;;  %vm181_vm2 = vcmp.lt.s32.totalorder %v180_v38, 2  ;;  %vm705_vm4 = vcmp.eq.s32.totalorder %v703_v13, %v1338_v0 }
  0xdc   :  { %vm843_vm13 = vcmp.lt.s32.totalorder %v842_v51, 0  ;;  %v859_v18 = vsel %vm705_vm4, 1.0, %v1158_v59 }
  0xdd   :  { %v265_v52 = vor.u32 %v264_v47, %v263_v45  ;;  %v268_v53 = vshll.u32 %v267_v49, 23  ;;  %v157_v55 = vsel %vm843_vm13, 0, %v842_v51  ;;  %v724_v47 = vadd.f32 %v860_v37, %v710_v35 }
  0xde   :  { %v158_v60 = vsub.s32 32, %v157_v55  ;;  %v162_v63 = vsub.s32 4294967266, %v157_v55  ;;  %v159_v5 = vshll.u32 %v150_v34, %v157_v55  ;;  %vm285_vm13 = vcmp.lt.s32.totalorder %v284_v33, 2 }
  0xdf   :  { %v269_v54 = vor.u32 4788187, %v268_v53  ;;  %v272_v4 = vcvt.s32.f32 %v265_v52 }
  0xe0   :  { %v160_v1 = vshrl.u32 %v142_v58, %v158_v60  ;;  %v163_v2 = vadd.s32 127, %v162_v63 }
  0xe1   :  { %v270_v3 = vand.u32 2147483647, %v269_v54 }
  0xe2   :  { %v161_v62 = vor.u32 %v160_v1, %v159_v5  ;;  %v164_v6 = vshll.u32 %v163_v2, 23 }
  0xe3   :  { %v273_v57 = vmul.f32 %v272_v4, %v270_v3 }
  0xe4   :  { %v165_v10 = vor.u32 4788187, %v164_v6  ;;  %v168_v61 = vcvt.s32.f32 %v161_v62  ;;  %v740_v62 = vld [vmem:[#allocation7 + $0x70] sm:$0xff]  ;;  %v739_v6 = vld [vmem:[#allocation7 + $0x68] sm:$0xff] }
  0xe5   :  { %v274_v7 = vxor.u32 2147483648, %v273_v57 }
  0xe6   :  { %v166_v11 = vand.u32 2147483647, %v165_v10  ;;  %v736_v10 = vld [vmem:[#allocation7 + $0x50] sm:$0xff] }
  0xe7   :  { %v275_v12 = vsel %vm192_vm14, %v274_v7, %v273_v57  ;;  %vm185_vm14 = vcmp.eq.s32.totalorder %v180_v38, 2  ;;  %v738_v7 = vld [vmem:[#allocation7 + $0x60] sm:$0xff] }
  0xe8   :  { %v278_v9 = vsel %vm1321_vm15, %v1234_v46, %v275_v12  ;;  %v169_v15 = vmul.f32 %v168_v61, %v166_v11  ;;  %vm405_vm15 = vcmp.eq.s32.totalorder %v403_v36, 0  ;;  %v737_v46 = vld [vmem:[#allocation7 + $0x58] sm:$0xff]  ;;  %v734_v12 = vld [vmem:[#allocation7 + $0x40] sm:$0xff]  ;;  %v732_v11 = vld [vmem:[#allocation7 + $0x30] sm:$0xff] }
  0xe9   :  { %1050 = vcosq.f32 %v278_v9  ;;  %v731_v61 = vld [vmem:[#allocation7 + $0x28] sm:$0xff] }
  0xea   :  { %1052 = vsinq.f32 %v278_v9  ;;  %v170_v17 = vxor.u32 2147483648, %v169_v15  ;;  %v730_v9 = vld [vmem:[#allocation7 + $0x20] sm:$0xff] }
  0xec   :  { %v171_v20 = vsel %vm88_vm0, %v170_v17, %v169_v15  ;;  %vm182_vm0 = vcmp.eq.s32.totalorder %v180_v38, 0  ;;  %v729_v15 = vld [vmem:[#allocation7 + $0x18] sm:$0xff]  ;;  %v857_v17 = vsel %vm693_vm3, 1.0, %v1158_v59 }
  0xed   :  { %v174_v21 = vsel %vm87_vm1, %v1231_v42, %v171_v20  ;;  %vm404_vm1 = vcmp.lt.s32.totalorder %v403_v36, 2  ;;  %v735_v42 = vld [vmem:[#allocation7 + $0x48] sm:$0xff]  ;;  %v726_v20 = vld [vmem:[#allocation7] sm:$0xff] }
  0xee   :  { %1054 = vcosq.f32 %v174_v21 }
  0xef   :  { %1056 = vsinq.f32 %v174_v21  ;;  %v711_v21 = vadd.f32 %v859_v18, %v857_v17 }
  0xf6   :  { %v1051_v26 = vpop.eup %1050 }
  0xf7   :  { %v1053_v31 = vpop.eup %1052  ;;  %v290_v34 = vxor.u32 2147483648, %v1051_v26 }
  0xf8   :  { %v287_v30 = vxor.u32 2147483648, %v1053_v31 }
  0xf9   :  { %v513_v41 = vsel %vm511_vm6, %v290_v34, %v1053_v31  ;;  %v291_v44 = vsel %vm289_vm8, %v290_v34, %v1053_v31 }
  0xfa   :  { %v510_v40 = vsel %vm508_vm5, %v1051_v26, %v287_v30  ;;  %v288_v43 = vsel %vm286_vm7, %v1051_v26, %v287_v30  ;;  %vm719_vm5 = vcmp.eq.s32.totalorder %v717_v14, %v1338_v0 }
  0xfb   :  { %v1055_v45 = vpop.eup %1054  ;;  %v514_v53 = vsel %vm507_vm12, %v510_v40, %v513_v41  ;;  %v292_v54 = vsel %vm285_vm13, %v288_v43, %v291_v44  ;;  %v861_v48 = vsel %vm719_vm5, 1.0, %v1158_v59 }
  0xfc   :  { %v1057_v49 = vpop.eup %1056  ;;  %v186_v51 = vxor.u32 2147483648, %v1055_v45  ;;  %v515_v5 = vsel %vm282_vm10, nan, %v514_v53  ;;  %v293_v1 = vsel %vm282_vm10, nan, %v292_v54  ;;  %v725_v22 = vadd.f32 %v861_v48, %v711_v21 }
  0xfd   :  { %v183_v52 = vxor.u32 2147483648, %v1057_v49 }
  0xfe   :  { %v410_v55 = vsel %vm408_vm11, %v186_v51, %v1057_v49  ;;  %v187_v58 = vsel %vm185_vm14, %v186_v51, %v1057_v49 }
  0xff   :  { %v407_v60 = vsel %vm405_vm15, %v1055_v45, %v183_v52  ;;  %v184_v63 = vsel %vm182_vm0, %v1055_v45, %v183_v52 }
 0x100   :  { %v411_v3 = vsel %vm404_vm1, %v407_v60, %v410_v55  ;;  %v188_v4 = vsel %vm181_vm2, %v184_v63, %v187_v58 }
 0x101   :  { %v412_v2 = vsel %vm178_vm9, nan, %v411_v3  ;;  %v189_v57 = vsel %vm178_vm9, nan, %v188_v4 }
 0x102   :  { %948 = vmatprep.mubr.f32.mxu0 %v412_v2  ;;  %983 = vmatprep.mubr.f32.mxu1 %v189_v57 }
 0x103   :  { %949 = vmatmul.mubr.f32.vlgmr.msra.gmra.mxu0 %v515_v5  ;;  %984 = vmatmul.mubr.f32.vlgmr.msra.gmra.mxu1 %v293_v1 }
 0x104   :  { %987 = vmatpush3.msra.mxu0 %v1225_v39  ;;  %1018 = vmatprep.mubr.f32.mxu0 %v724_v47  ;;  %v733_v39 = vld [vmem:[#allocation7 + $0x38] sm:$0xff] }
 0x105   :  { %988 = vmatprep.subr.mxu0 %v740_v62 }
 0x106   :  { %989 = vmatpush3.msra.mxu0 %v740_v62 }
 0x107   :  { %990 = vmatprep.subr.mxu0 %v739_v6 }
 0x108   :  { %991 = vmatpush3.msra.mxu0 %v739_v6 }
 0x109   :  { %992 = vmatprep.subr.mxu0 %v738_v7 }
 0x10a   :  { %993 = vmatpush3.msra.mxu0 %v738_v7 }
 0x10b   :  { %994 = vmatprep.subr.mxu0 %v737_v46 }
 0x10c   :  { %995 = vmatpush3.msra.mxu0 %v737_v46 }
 0x10d   :  { %996 = vmatprep.subr.mxu0 %v736_v10 }
 0x10e   :  { %997 = vmatpush3.msra.mxu0 %v736_v10 }
 0x10f   :  { %998 = vmatprep.subr.mxu0 %v735_v42 }
 0x110   :  { %999 = vmatpush3.msra.mxu0 %v735_v42 }
 0x111   :  { %1000 = vmatprep.subr.mxu0 %v734_v12 }
 0x112   :  { %1001 = vmatpush3.msra.mxu0 %v734_v12 }
 0x113   :  { %1002 = vmatprep.subr.mxu0 %v733_v39 }
 0x114   :  { %1003 = vmatpush3.msra.mxu0 %v733_v39 }
 0x115   :  { %1004 = vmatprep.subr.mxu0 %v732_v11 }
 0x116   :  { %1005 = vmatpush3.msra.mxu0 %v732_v11 }
 0x117   :  { %1006 = vmatprep.subr.mxu0 %v731_v61 }
 0x118   :  { %1007 = vmatpush3.msra.mxu0 %v731_v61 }
 0x119   :  { %1008 = vmatprep.subr.mxu0 %v730_v9 }
 0x11a   :  { %1009 = vmatpush3.msra.mxu0 %v730_v9 }
 0x11b   :  { %1010 = vmatprep.subr.mxu0 %v729_v15 }
 0x11c   :  { %1011 = vmatpush3.msra.mxu0 %v729_v15 }
 0x11d   :  { %1012 = vmatprep.subr.mxu0 %v728_v16 }
 0x11e   :  { %1013 = vmatpush3.msra.mxu0 %v728_v16 }
 0x11f   :  { %1014 = vmatprep.subr.mxu0 %v727_v19 }
 0x120   :  { %1015 = vmatpush3.msra.mxu0 %v727_v19 }
 0x121   :  { %1016 = vmatprep.subr.mxu0 %v726_v20 }
 0x122   :  { %1017 = vmatpush3.msra.mxu0 %v726_v20 }
 0x123   :  { %1019 = vmatmul.mubr.f32.vlgmr.msra.gmra.mxu0 %v725_v22 }
 0x1c3   :  { %v950_v56 = vpop.f32.mrf.mxu0  ;;  %v985_v0 = vpop.f32.mrf.mxu1 }
 0x1c4   :  { %v679_v8 = vadd.f32 %v985_v0, %v950_v56 }
 0x1c5   :  { %v598_v23 = vpop.f32.mrf.mxu0  ;;  %v673_v24 = vpop.f32.mrf.mxu1 }
 0x1c6   :  { %v674_v25 = vadd.f32 %v673_v24, %v598_v23 }
 0x1e3   :  { %v1020_v50 = vpop.f32.mrf.mxu0 }
 0x1e4   :  { %v818_v26 = vadd.f32 %v1020_v50, %v679_v8 }
 0x1e5   :  { %v808_v59 = vpop.f32.mrf.mxu0 }
 0x1e6   :  { %820 = vst [vmem:[#allocation8 + $0x8] sm:$0xff] %v818_v26  ;;  %v817_v27 = vadd.f32 %v808_v59, %v674_v25 }
 0x1e8   :  { %819 = vst [vmem:[#allocation8] sm:$0xff] %v817_v27 }
 0x1e9   :  { %1129 = shalt.err (!%p1126_p5)
}
 0x1ea   :  { %832 = dma.vmem_to_hbm [thread:$0]  %s827_s19, 256, %s1376_s6, [#allocation4], %s1146_s26, %s1146_s26, %s1147_s27  }
 0x1eb   :  { %1142 = dma.done.wait [#allocation4], 256  }
 0x1ec   :  { %1143 = vsyncadd [#allocation4], 4294967040 }
 0x1ed   :  { %836 = vsyncpa [#allocation3], 1 }
 0x1ee   :  { %837 = vsyncpa [#allocation6], 1 }
 0x1ef   :  { %838 = vsyncpa [#allocation4], 1 }

</bundles_post_ra>
